<compile_context>
chip_gen: v7x
topology: tpu7x:2x2x1
jax: 0.10.0
libtpu: 0.0.40
codegen_flags: <defaults>
</compile_context>

<pallas_src>
import functools

import numpy as np
import jax
import jax.numpy as jnp
from jax.experimental import pallas as pl


LANE = 128          # lane-dense classifier / output width


def _round_up(x, m):
    return ((x + m - 1) // m) * m


def slab_offsets(in_pad, wpad):
    """Row offsets of the packed weight/bias slab (weight blocks 8-aligned)."""
    pw1 = 0
    pw2 = pw1 + in_pad
    pw3 = pw2 + wpad
    gw1 = pw3 + wpad
    gw2 = gw1 + wpad
    gw3 = gw2 + wpad
    b0 = gw3 + wpad          # 6 bias rows: pb1 pb2 pb3 gb1 gb2 gb3
    rows = b0 + 6
    return dict(pw1=pw1, pw2=pw2, pw3=pw3, gw1=gw1, gw2=gw2, gw3=gw3,
                b0=b0, rows=rows)


# ----------------------------------------------------------------------------
# Fused kernel: patch embedder + weighted readout + mesh embedder + classifier
# ----------------------------------------------------------------------------
def make_fused_kernel(in_pad, wpad):
    off = slab_offsets(in_pad, wpad)
    PW1, PW2, PW3 = off["pw1"], off["pw2"], off["pw3"]
    GW1, GW2, GW3 = off["gw1"], off["gw2"], off["gw3"]
    B0 = off["b0"]

    def kernel(xflat_ref, w_ref, adj_ref, apool_ref, wc_ref, out_ref):
        # bf16 MXU operands, f32 accumulation; elementwise (bias/ReLU) in f32.
        def dot(a, b):
            return jnp.dot(a.astype(jnp.bfloat16), b.astype(jnp.bfloat16),
                           preferred_element_type=jnp.float32)

        def bias(i):
            return w_ref[B0 + i:B0 + i + 1, :]                   # (1, wpad) f32

        # ---- patch embedder: 3 per-node (1x1 conv) layers on all patches ----
        x = xflat_ref[...]                                       # (P*nodes, in_pad)
        h = jnp.maximum(dot(x, w_ref[PW1:PW2, :]) + bias(0), 0.0)
        h = jnp.maximum(dot(h, w_ref[PW2:PW3, :]) + bias(1), 0.0)
        h = jnp.maximum(dot(h, w_ref[PW3:GW1, :]) + bias(2), 0.0)  # (P*nodes, wpad)

        # weighted per-patch readout fused with GCN layer 1's adjacency:
        # a_pool = adj @ pool was precomputed on the host (constant fold).
        r = dot(apool_ref[...], h)                               # (P, wpad)
        h1 = jnp.maximum(dot(r, w_ref[GW1:GW2, :]) + bias(3), 0.0)

        # ---- mesh embedder: GCN layers 2 & 3 (A @ H @ W + b, ReLU) ----
        a = adj_ref[...]                                         # (P, P)
        h2 = jnp.maximum(dot(dot(a, h1), w_ref[GW2:GW3, :]) + bias(4), 0.0)
        h3 = jnp.maximum(dot(dot(a, h2), w_ref[GW3:B0, :]) + bias(5), 0.0)

        # Jumping-knowledge concat + classifier as ONE matmul (1/P mean over
        # mesh nodes is folded into wc on the host); the mean becomes a
        # sublane XLU reduce instead of a trailing MXU matmul.
        hcat = jnp.concatenate([h1, h2, h3], axis=1)             # (P, 3*wpad)
        s = dot(hcat, wc_ref[...])                               # (P, LANE)
        out_ref[...] = jnp.sum(s, axis=0, keepdims=True)         # (1, LANE)

    return kernel


def forward(kernel, xflat, w_slab, adj, a_pool, wc_full, out_feats):
    """Single fused, grid-less pallas_call; returns (1, out_feats) logits."""
    out = pl.pallas_call(
        kernel,
        out_shape=jax.ShapeDtypeStruct((1, LANE), jnp.float32),
    )(xflat, w_slab, adj, a_pool, wc_full)
    return out[:, :out_feats]


# ----------------------------------------------------------------------------
# Deterministic synthetic parameters, packed for the kernel
# ----------------------------------------------------------------------------
def init_packed_params(in_dim, hidden, out_feats, P, key, in_pad, wpad):
    pe_hidden = in_dim * 4         # READOUTWEIGHTSPEmbedder3Conv hidden_dim
    embed = pe_hidden              # patch embedder output dim
    ks = jax.random.split(key, 9)

    def rnd(k, shp):
        return np.asarray(jax.random.normal(k, shp, jnp.float32)) / np.sqrt(shp[0])

    raw = dict(
        pw1=rnd(ks[0], (in_dim, pe_hidden)),
        pw2=rnd(ks[1], (pe_hidden, pe_hidden)),
        pw3=rnd(ks[2], (pe_hidden, embed)),
        gw1=rnd(ks[3], (embed, hidden)),
        gw2=rnd(ks[4], (hidden, hidden)),
        gw3=rnd(ks[5], (hidden, hidden)),
        wc1=rnd(ks[6], (hidden, out_feats)),
        wc2=rnd(ks[7], (hidden, out_feats)),
        wc3=rnd(ks[8], (hidden, out_feats)),
    )

    off = slab_offsets(in_pad, wpad)
    slab = np.zeros((off["rows"], wpad), np.float32)
    slab[off["pw1"]:off["pw1"] + in_dim, :pe_hidden] = raw["pw1"]
    slab[off["pw2"]:off["pw2"] + pe_hidden, :pe_hidden] = raw["pw2"]
    slab[off["pw3"]:off["pw3"] + pe_hidden, :embed] = raw["pw3"]
    slab[off["gw1"]:off["gw1"] + embed, :hidden] = raw["gw1"]
    slab[off["gw2"]:off["gw2"] + hidden, :hidden] = raw["gw2"]
    slab[off["gw3"]:off["gw3"] + hidden, :hidden] = raw["gw3"]
    # bias rows off["b0"] .. off["b0"]+5 stay zero (biases initialized to 0)

    # classifier Linear(3*hidden -> out_feats, bias=False): stacked per JK
    # layer, 1/P mean-over-mesh-nodes folded in, zero-padded to 128 lanes.
    wc = np.zeros((3 * wpad, LANE), np.float32)
    for i, name in enumerate(("wc1", "wc2", "wc3")):
        wc[i * wpad:i * wpad + hidden, :out_feats] = raw[name] / P

    return jnp.asarray(slab), jnp.asarray(wc), raw


def reference_forward(patches_flat, pool, adj, raw, out_feats):
    """Pure-f32 numpy reference of the same forward (biases are zero)."""
    relu = lambda v: np.maximum(v, 0.0)
    h = relu(patches_flat @ raw["pw1"])
    h = relu(h @ raw["pw2"])
    h = relu(h @ raw["pw3"])
    readouts = pool @ h
    h1 = relu(adj @ readouts @ raw["gw1"])
    h2 = relu(adj @ h1 @ raw["gw2"])
    h3 = relu(adj @ h2 @ raw["gw3"])
    jk = np.concatenate([h1, h2, h3], axis=1)
    mesh_embedding = jk.mean(axis=0, keepdims=True)
    wc = np.concatenate([raw["wc1"], raw["wc2"], raw["wc3"]], axis=0)
    return (mesh_embedding @ wc)[:, :out_feats]


if __name__ == "__main__":
    # small shapes consistent with the module's forward
    in_dim = 4          # aggregated_feats channels per patch node
    node_numbers = 16   # nodes per spider patch
    hidden = 32         # mesh embedder hidden dim
    out_feats = 6       # classifier output classes
    P = 8               # number of spider patches == mesh nodes

    in_pad = _round_up(max(in_dim, 8), 8)
    wpad = _round_up(max(hidden, in_dim * 4, 8), 8)

    key = jax.random.PRNGKey(0)
    kx, kp = jax.random.split(key)

    # patches: [P, nodes, in_dim]
    patches = np.asarray(jax.random.normal(kx, (P, node_numbers, in_dim),
                                           jnp.float32))

    # rng(22) permutation of the patch order (as in the original forward);
    # mesh adjacency keeps its original order (reorder_graph result unused).
    rng = np.random.default_rng(22)
    perm = rng.permutation(P)
    patches = patches[perm]

    patches_flat = patches.reshape(P * node_numbers, in_dim).astype(np.float32)
    xflat = jnp.asarray(np.pad(patches_flat, ((0, 0), (0, in_pad - in_dim))))

    # per-patch readout-weight / pooling matrix (uniform -> mean readout)
    pool = np.zeros((P, P * node_numbers), np.float32)
    for p in range(P):
        pool[p, p * node_numbers:(p + 1) * node_numbers] = 1.0 / node_numbers

    # synthetic mesh graph: ring over P nodes + self loops, row-normalized
    adj_np = np.eye(P, dtype=np.float32)
    for i in range(P):
        adj_np[i, (i + 1) % P] = 1.0
        adj_np[i, (i - 1) % P] = 1.0
    adj_np = adj_np / adj_np.sum(axis=1, keepdims=True)

    a_pool = jnp.asarray(adj_np @ pool)        # host-side constant fold
    adj = jnp.asarray(adj_np)

    w_slab, wc_full, raw = init_packed_params(in_dim, hidden, out_feats, P, kp,
                                              in_pad, wpad)

    kernel = make_fused_kernel(in_pad, wpad)
    fwd = jax.jit(functools.partial(forward, kernel), static_argnums=(5,))

    logits = fwd(xflat, w_slab, adj, a_pool, wc_full, out_feats)
    jax.block_until_ready(logits)

    assert logits.shape == (1, out_feats)
    assert bool(jnp.all(jnp.isfinite(logits)))

    # validate against the pure-f32 reference (loose tol: bf16 MXU operands)
    ref = reference_forward(patches_flat, pool, adj_np, raw, out_feats)
    np.testing.assert_allclose(np.asarray(logits), ref, rtol=5e-2, atol=5e-2)

    print("KERNEL_OK")
</pallas_src>

<mosaic_0001>
module attributes {stable_mosaic.version = 11 : i64} {
  func.func @kernel(%arg0: memref<128x8xf32, #tpu.memory_space<vmem>>, %arg1: memref<174x32xf32, #tpu.memory_space<vmem>>, %arg2: memref<8x8xf32, #tpu.memory_space<vmem>>, %arg3: memref<8x128xf32, #tpu.memory_space<vmem>>, %arg4: memref<96x128xf32, #tpu.memory_space<vmem>>, %arg5: memref<1x128xf32, #tpu.memory_space<vmem>>) attributes {dimension_semantics = [], scalar_prefetch = 0 : i64, scratch_operands = 0 : i64, tpu.core_type = #tpu.core_type<tc>} {
    %c0 = arith.constant 0 : index
    %c0_0 = arith.constant 0 : index
    %0 = vector.load %arg0[%c0, %c0_0] : memref<128x8xf32, #tpu.memory_space<vmem>>, vector<128x8xf32>
    %c0_1 = arith.constant 0 : index
    %c0_2 = arith.constant 0 : index
    %1 = vector.load %arg1[%c0_1, %c0_2] : memref<174x32xf32, #tpu.memory_space<vmem>>, vector<8x32xf32>
    %2 = arith.truncf %0 : vector<128x8xf32> to vector<128x8xbf16>
    %3 = arith.truncf %1 : vector<8x32xf32> to vector<8x32xbf16>
    %cst = arith.constant dense<0.000000e+00> : vector<128x32xf32>
    %4 = tpu.matmul %2, %3, %cst {dimension_numbers = #tpu.dot_dimension_numbers<[1], [0], [0], [1], [0, 0, 1, 1], [], []>} : vector<128x8xbf16>, vector<8x32xbf16>, vector<128x32xf32> -> vector<128x32xf32>
    %c168 = arith.constant 168 : index
    %c0_3 = arith.constant 0 : index
    %5 = vector.load %arg1[%c168, %c0_3] : memref<174x32xf32, #tpu.memory_space<vmem>>, vector<1x32xf32>
    %6 = vector.broadcast %5 : vector<1x32xf32> to vector<128x32xf32>
    %7 = arith.addf %4, %6 : vector<128x32xf32>
    %cst_4 = arith.constant 0.000000e+00 : f32
    %8 = vector.broadcast %cst_4 : f32 to vector<128x32xf32>
    %9 = arith.maximumf %7, %8 : vector<128x32xf32>
    %c8 = arith.constant 8 : index
    %c0_5 = arith.constant 0 : index
    %10 = vector.load %arg1[%c8, %c0_5] : memref<174x32xf32, #tpu.memory_space<vmem>>, vector<32x32xf32>
    %11 = arith.truncf %9 : vector<128x32xf32> to vector<128x32xbf16>
    %12 = arith.truncf %10 : vector<32x32xf32> to vector<32x32xbf16>
    %cst_6 = arith.constant dense<0.000000e+00> : vector<128x32xf32>
    %13 = tpu.matmul %11, %12, %cst_6 {dimension_numbers = #tpu.dot_dimension_numbers<[1], [0], [0], [1], [0, 0, 1, 1], [], []>} : vector<128x32xbf16>, vector<32x32xbf16>, vector<128x32xf32> -> vector<128x32xf32>
    %c169 = arith.constant 169 : index
    %c0_7 = arith.constant 0 : index
    %14 = vector.load %arg1[%c169, %c0_7] : memref<174x32xf32, #tpu.memory_space<vmem>>, vector<1x32xf32>
    %15 = vector.broadcast %14 : vector<1x32xf32> to vector<128x32xf32>
    %16 = arith.addf %13, %15 : vector<128x32xf32>
    %cst_8 = arith.constant 0.000000e+00 : f32
    %17 = vector.broadcast %cst_8 : f32 to vector<128x32xf32>
    %18 = arith.maximumf %16, %17 : vector<128x32xf32>
    %c40 = arith.constant 40 : index
    %c0_9 = arith.constant 0 : index
    %19 = vector.load %arg1[%c40, %c0_9] : memref<174x32xf32, #tpu.memory_space<vmem>>, vector<32x32xf32>
    %20 = arith.truncf %18 : vector<128x32xf32> to vector<128x32xbf16>
    %21 = arith.truncf %19 : vector<32x32xf32> to vector<32x32xbf16>
    %cst_10 = arith.constant dense<0.000000e+00> : vector<128x32xf32>
    %22 = tpu.matmul %20, %21, %cst_10 {dimension_numbers = #tpu.dot_dimension_numbers<[1], [0], [0], [1], [0, 0, 1, 1], [], []>} : vector<128x32xbf16>, vector<32x32xbf16>, vector<128x32xf32> -> vector<128x32xf32>
    %c170 = arith.constant 170 : index
    %c0_11 = arith.constant 0 : index
    %23 = vector.load %arg1[%c170, %c0_11] : memref<174x32xf32, #tpu.memory_space<vmem>>, vector<1x32xf32>
    %24 = vector.broadcast %23 : vector<1x32xf32> to vector<128x32xf32>
    %25 = arith.addf %22, %24 : vector<128x32xf32>
    %cst_12 = arith.constant 0.000000e+00 : f32
    %26 = vector.broadcast %cst_12 : f32 to vector<128x32xf32>
    %27 = arith.maximumf %25, %26 : vector<128x32xf32>
    %c0_13 = arith.constant 0 : index
    %c0_14 = arith.constant 0 : index
    %28 = vector.load %arg3[%c0_13, %c0_14] : memref<8x128xf32, #tpu.memory_space<vmem>>, vector<8x128xf32>
    %29 = arith.truncf %28 : vector<8x128xf32> to vector<8x128xbf16>
    %30 = arith.truncf %27 : vector<128x32xf32> to vector<128x32xbf16>
    %cst_15 = arith.constant dense<0.000000e+00> : vector<8x32xf32>
    %31 = tpu.matmul %29, %30, %cst_15 {dimension_numbers = #tpu.dot_dimension_numbers<[1], [0], [0], [1], [0, 0, 1, 1], [], []>} : vector<8x128xbf16>, vector<128x32xbf16>, vector<8x32xf32> -> vector<8x32xf32>
    %c72 = arith.constant 72 : index
    %c0_16 = arith.constant 0 : index
    %32 = vector.load %arg1[%c72, %c0_16] : memref<174x32xf32, #tpu.memory_space<vmem>>, vector<32x32xf32>
    %33 = arith.truncf %31 : vector<8x32xf32> to vector<8x32xbf16>
    %34 = arith.truncf %32 : vector<32x32xf32> to vector<32x32xbf16>
    %cst_17 = arith.constant dense<0.000000e+00> : vector<8x32xf32>
    %35 = tpu.matmul %33, %34, %cst_17 {dimension_numbers = #tpu.dot_dimension_numbers<[1], [0], [0], [1], [0, 0, 1, 1], [], []>} : vector<8x32xbf16>, vector<32x32xbf16>, vector<8x32xf32> -> vector<8x32xf32>
    %c171 = arith.constant 171 : index
    %c0_18 = arith.constant 0 : index
    %36 = vector.load %arg1[%c171, %c0_18] : memref<174x32xf32, #tpu.memory_space<vmem>>, vector<1x32xf32>
    %37 = vector.broadcast %36 : vector<1x32xf32> to vector<8x32xf32>
    %38 = arith.addf %35, %37 : vector<8x32xf32>
    %cst_19 = arith.constant 0.000000e+00 : f32
    %39 = vector.broadcast %cst_19 : f32 to vector<8x32xf32>
    %40 = arith.maximumf %38, %39 : vector<8x32xf32>
    %c0_20 = arith.constant 0 : index
    %c0_21 = arith.constant 0 : index
    %41 = vector.load %arg2[%c0_20, %c0_21] : memref<8x8xf32, #tpu.memory_space<vmem>>, vector<8x8xf32>
    %42 = arith.truncf %41 : vector<8x8xf32> to vector<8x8xbf16>
    %43 = arith.truncf %40 : vector<8x32xf32> to vector<8x32xbf16>
    %cst_22 = arith.constant dense<0.000000e+00> : vector<8x32xf32>
    %44 = tpu.matmul %42, %43, %cst_22 {dimension_numbers = #tpu.dot_dimension_numbers<[1], [0], [0], [1], [0, 0, 1, 1], [], []>} : vector<8x8xbf16>, vector<8x32xbf16>, vector<8x32xf32> -> vector<8x32xf32>
    %c104 = arith.constant 104 : index
    %c0_23 = arith.constant 0 : index
    %45 = vector.load %arg1[%c104, %c0_23] : memref<174x32xf32, #tpu.memory_space<vmem>>, vector<32x32xf32>
    %46 = arith.truncf %44 : vector<8x32xf32> to vector<8x32xbf16>
    %47 = arith.truncf %45 : vector<32x32xf32> to vector<32x32xbf16>
    %cst_24 = arith.constant dense<0.000000e+00> : vector<8x32xf32>
    %48 = tpu.matmul %46, %47, %cst_24 {dimension_numbers = #tpu.dot_dimension_numbers<[1], [0], [0], [1], [0, 0, 1, 1], [], []>} : vector<8x32xbf16>, vector<32x32xbf16>, vector<8x32xf32> -> vector<8x32xf32>
    %c172 = arith.constant 172 : index
    %c0_25 = arith.constant 0 : index
    %49 = vector.load %arg1[%c172, %c0_25] : memref<174x32xf32, #tpu.memory_space<vmem>>, vector<1x32xf32>
    %50 = vector.broadcast %49 : vector<1x32xf32> to vector<8x32xf32>
    %51 = arith.addf %48, %50 : vector<8x32xf32>
    %cst_26 = arith.constant 0.000000e+00 : f32
    %52 = vector.broadcast %cst_26 : f32 to vector<8x32xf32>
    %53 = arith.maximumf %51, %52 : vector<8x32xf32>
    %54 = arith.truncf %41 : vector<8x8xf32> to vector<8x8xbf16>
    %55 = arith.truncf %53 : vector<8x32xf32> to vector<8x32xbf16>
    %cst_27 = arith.constant dense<0.000000e+00> : vector<8x32xf32>
    %56 = tpu.matmul %54, %55, %cst_27 {dimension_numbers = #tpu.dot_dimension_numbers<[1], [0], [0], [1], [0, 0, 1, 1], [], []>} : vector<8x8xbf16>, vector<8x32xbf16>, vector<8x32xf32> -> vector<8x32xf32>
    %c136 = arith.constant 136 : index
    %c0_28 = arith.constant 0 : index
    %57 = vector.load %arg1[%c136, %c0_28] : memref<174x32xf32, #tpu.memory_space<vmem>>, vector<32x32xf32>
    %58 = arith.truncf %56 : vector<8x32xf32> to vector<8x32xbf16>
    %59 = arith.truncf %57 : vector<32x32xf32> to vector<32x32xbf16>
    %cst_29 = arith.constant dense<0.000000e+00> : vector<8x32xf32>
    %60 = tpu.matmul %58, %59, %cst_29 {dimension_numbers = #tpu.dot_dimension_numbers<[1], [0], [0], [1], [0, 0, 1, 1], [], []>} : vector<8x32xbf16>, vector<32x32xbf16>, vector<8x32xf32> -> vector<8x32xf32>
    %c173 = arith.constant 173 : index
    %c0_30 = arith.constant 0 : index
    %61 = vector.load %arg1[%c173, %c0_30] : memref<174x32xf32, #tpu.memory_space<vmem>>, vector<1x32xf32>
    %62 = vector.broadcast %61 : vector<1x32xf32> to vector<8x32xf32>
    %63 = arith.addf %60, %62 : vector<8x32xf32>
    %cst_31 = arith.constant 0.000000e+00 : f32
    %64 = vector.broadcast %cst_31 : f32 to vector<8x32xf32>
    %65 = arith.maximumf %63, %64 : vector<8x32xf32>
    %66 = tpu.concatenate %40, %53, %65 in 1 : vector<8x32xf32>, vector<8x32xf32>, vector<8x32xf32> -> vector<8x96xf32>
    %c0_32 = arith.constant 0 : index
    %c0_33 = arith.constant 0 : index
    %67 = vector.load %arg4[%c0_32, %c0_33] : memref<96x128xf32, #tpu.memory_space<vmem>>, vector<96x128xf32>
    %68 = arith.truncf %66 : vector<8x96xf32> to vector<8x96xbf16>
    %69 = arith.truncf %67 : vector<96x128xf32> to vector<96x128xbf16>
    %cst_34 = arith.constant dense<0.000000e+00> : vector<8x128xf32>
    %70 = tpu.matmul %68, %69, %cst_34 {dimension_numbers = #tpu.dot_dimension_numbers<[1], [0], [0], [1], [0, 0, 1, 1], [], []>} : vector<8x96xbf16>, vector<96x128xbf16>, vector<8x128xf32> -> vector<8x128xf32>
    %cst_35 = arith.constant dense<0.000000e+00> : vector<128xf32>
    %71 = vector.multi_reduction <add>, %70, %cst_35 [0] : vector<8x128xf32> to vector<128xf32>
    %72 = vector.shape_cast %71 : vector<128xf32> to vector<1x128xf32>
    %c0_36 = arith.constant 0 : index
    %c0_37 = arith.constant 0 : index
    %73 = vector.load %arg5[%c0_36, %c0_37] : memref<1x128xf32, #tpu.memory_space<vmem>>, vector<1x128xf32>
    tpu.vector_store %arg5[%c0_36, %c0_37], %72 {strides = array<i32>} : memref<1x128xf32, #tpu.memory_space<vmem>>, vector<1x128xf32>,
    return
  }
}

</mosaic_0001>

<bundles_post_ra>
// kernel: forward.1
= control target key start
LH: loop header
LB: loop body
LE: loop exit
PB: predicated region body
PF: predicated region fallthrough
CT: control target
= control target key end

     0   :  { %vm78_vm0 = vcmask 1043456   ;;  %vm53_vm1 = vcmask 64512   ;;  %s1461_s0 = inlined_call_operand.vmem [shape: f32[128,8], index: 0, kind: input, shape index: {}]   ;;  %s1462_s1 = inlined_call_operand.vmem [shape: f32[174,32], index: 1, kind: input, shape index: {}]   ;;  %s1463_s2 = inlined_call_operand.vmem [shape: f32[8,8], index: 2, kind: input, shape index: {}]   ;;  %s1464_s3 = inlined_call_operand.vmem [shape: f32[8,128], index: 3, kind: input, shape index: {}]   ;;  %s1465_s4 = inlined_call_operand.vmem [shape: f32[96,128], index: 4, kind: input, shape index: {}]   ;;  %s1466_s5 = inlined_call_operand.hbm [shape: f32[1,128], index: 5, kind: output, shape index: {}]  }
   0x1   :  { %v38_v0 = vld [vmem:[%s1462_s1] sm:$0xff]  ;;  %v23_v2 = vld [vmem:[%s1461_s0 + $0x8] sm:$0xff]  ;;  %v24_v5 = vld [vmem:[%s1461_s0 + $0x10] sm:$0xff] }
   0x2   :  { %v22_v1 = vld [vmem:[%s1461_s0] sm:$0xff]  ;;  %v47_v3 = vpack.c.bf16 %v38_v0, %v38_v0  ;;  %v25_v6 = vld [vmem:[%s1461_s0 + $0x18] sm:$0xff]  ;;  %v27_v8 = vld [vmem:[%s1461_s0 + $0x28] sm:$0xff] }
   0x3   :  { %v39_v4 = vpack.c.bf16 %v23_v2, %v22_v1  ;;  %v26_v7 = vld [vmem:[%s1461_s0 + $0x20] sm:$0xff]  ;;  %v40_v10 = vpack.c.bf16 %v25_v6, %v24_v5 }
   0x4   :  { %1138 = vmatprep.subr.msk.bf16.mxu0 %vm78_vm0, %v47_v3  ;;  %v80_v9 = vsel %vm78_vm0, %v47_v3, 0  ;;  %v41_v11 = vpack.c.bf16 %v27_v8, %v26_v7 }
   0x5   :  { %1010 = vmatprep.mubr.msk.bf16.mxu0 %vm53_vm1, %v39_v4  ;;  %1009 = vmatpush3.bf16.msra.mxu0 %v80_v9 }
   0x6   :  { %10 = vsyncpa [#allocation3], 0  ;;  %v28_v12 = vld [vmem:[%s1461_s0 + $0x30] sm:$0xff]  ;;  %v29_v13 = vld [vmem:[%s1461_s0 + $0x38] sm:$0xff]  ;;  %vm214_vm2 = vcmask 261120   ;;  %vm1169_vm3 = vmmov 0  }
   0x7   :  { %v30_v14 = vld [vmem:[%s1461_s0 + $0x40] sm:$0xff]  ;;  %v31_v15 = vld [vmem:[%s1461_s0 + $0x48] sm:$0xff]  ;;  %v42_v16 = vpack.c.bf16 %v29_v13, %v28_v12  ;;  %v32_v18 = vld [vmem:[%s1461_s0 + $0x50] sm:$0xff]  ;;  %s1170_s19 = smov 32   ;;  %s1171_s26 = smov 64   ;;  %vm828_vm4 = vcmask 523264  }
   0x8   :  { %1011 = vmatmul.mubr.msk.bf16.vlgmr.msra.gmra.mrb[0].mxu0 %vm53_vm1, %v40_v10  ;;  %v43_v17 = vpack.c.bf16 %v31_v15, %v30_v14  ;;  %v33_v19 = vld [vmem:[%s1461_s0 + $0x58] sm:$0xff]  ;;  %v34_v20 = vld [vmem:[%s1461_s0 + $0x60] sm:$0xff]  ;;  %v35_v21 = vld [vmem:[%s1461_s0 + $0x68] sm:$0xff]  ;;  %vm849_vm5 = vcmask 785408  }
   0x9   :  { %1014 = vmatprep.mubr.msk.bf16.mxu0 %vm53_vm1, %v41_v11  ;;  %v44_v22 = vpack.c.bf16 %v33_v19, %v32_v18  ;;  %v45_v23 = vpack.c.bf16 %v35_v21, %v34_v20  ;;  %v36_v24 = vld [vmem:[%s1461_s0 + $0x70] sm:$0xff]  ;;  %v37_v25 = vld [vmem:[%s1461_s0 + $0x78] sm:$0xff]  ;;  %v195_v27 = vld [vmem:[%s1462_s1 + $0x8] sm:$0xff] }
   0xa   :  { %v46_v26 = vpack.c.bf16 %v37_v25, %v36_v24  ;;  %v196_v28 = vld [vmem:[%s1462_s1 + $0x10] sm:$0xff]  ;;  %v197_v30 = vld [vmem:[%s1462_s1 + $0x18] sm:$0xff]  ;;  %v198_v31 = vld [vmem:[%s1462_s1 + $0x20] sm:$0xff] }
   0xb   :  { %v207_v29 = vpack.c.bf16 %v196_v28, %v195_v27  ;;  %v208_v32 = vpack.c.bf16 %v198_v31, %v197_v30  ;;  %v352_v33 = vld [vmem:[%s1462_s1 + $0x28] sm:$0xff]  ;;  %v353_v34 = vld [vmem:[%s1462_s1 + $0x30] sm:$0xff]  ;;  %v354_v35 = vld [vmem:[%s1462_s1 + $0x38] sm:$0xff] }
   0xc   :  { %v364_v36 = vpack.c.bf16 %v353_v34, %v352_v33  ;;  %v355_v37 = vld [vmem:[%s1462_s1 + $0x40] sm:$0xff]  ;;  %v914_v39 = vld [vmem:[%s1462_s1 + $0xa8] ss:$0 sm:$0xff] }
   0xd   :  { %1026 = vmatprep.subr.bf16.mxu1 %v207_v29  ;;  %v365_v38 = vpack.c.bf16 %v355_v37, %v354_v35 }
   0xe   :  { %1027 = vmatpush3.bf16.msra.mxu1 %v207_v29  ;;  %1046 = vmatprep.subr.bf16.mxu0 %v364_v36 }
   0xf   :  { %1028 = vmatprep.subr.bf16.mxu1 %v208_v32  ;;  %1047 = vmatpush3.bf16.msra.mxu0 %v364_v36 }
  0x10   :  { %1015 = vmatmul.mubr.msk.bf16.gmra.mrb[4].mxu0 %vm53_vm1, %v42_v16  ;;  %1048 = vmatprep.subr.bf16.mxu0 %v365_v38 }
  0x11   :  { %1018 = vmatprep.mubr.msk.bf16.mxu0 %vm53_vm1, %v43_v17 }
  0x12   :  { %1029 = vmatpush3.bf16.msra.mxu1 %v208_v32  ;;  %v923_v32 = vld [vmem:[%s1462_s1 + $0xa9] ss:$0 sm:$0xff] }
  0x13   :  { %1049 = vmatpush3.bf16.msra.mxu0 %v365_v38 }
  0x18   :  { %1019 = vmatmul.mubr.msk.bf16.gmra.mrb[8].mxu0 %vm53_vm1, %v44_v22 }
  0x19   :  { %1022 = vmatprep.mubr.msk.bf16.mxu0 %vm53_vm1, %v45_v23 }
  0x20   :  { %1023 = vmatmul.mubr.msk.bf16.gmra.mrb[12].mxu0 %vm53_vm1, %v46_v26 }
  0xdb   :  { %v1012_v40 = vpop.f32.mrb[0].mxu0 }
  0xdc   :  { %v125_v41 = vadd.f32 %v1012_v40, %v914_v39  ;;  %v116_v42 = vpop.f32.mrb[1].mxu0 }
  0xdd   :  { %v117_v43 = vadd.f32 %v914_v39, %v116_v42  ;;  %v1013_v44 = vpop.f32.mrb[2].mxu0 }
  0xde   :  { %v128_v45 = vadd.f32 %v1013_v44, %v914_v39  ;;  %v119_v46 = vpop.f32.mrb[3].mxu0  ;;  %v181_v48 = vmax.f32 %v125_v41, 0.0 }
  0xdf   :  { %v120_v47 = vadd.f32 %v914_v39, %v119_v46  ;;  %v179_v50 = vmax.f32 %v117_v43, 0.0 }
  0xe0   :  { %v182_v49 = vmax.f32 %v128_v45, 0.0 }
  0xe1   :  { %v180_v51 = vmax.f32 %v120_v47, 0.0 }
  0xe2   :  { %v200_v52 = vpack.c.bf16 %v182_v49, %v181_v48 }
  0xe3   :  { %v1016_v53 = vpop.f32.mrb[4].mxu0  ;;  %v199_v54 = vpack.c.bf16 %v180_v51, %v179_v50 }
  0xe4   :  { %v141_v55 = vadd.f32 %v1016_v53, %v914_v39  ;;  %v132_v56 = vpop.f32.mrb[5].mxu0 }
  0xe5   :  { %v133_v57 = vadd.f32 %v914_v39, %v132_v56  ;;  %v1017_v58 = vpop.f32.mrb[6].mxu0  ;;  %1030 = vmatprep.mubr.msk.bf16.mxu1 %vm214_vm2, %v199_v54 }
  0xe6   :  { %v144_v59 = vadd.f32 %v1017_v58, %v914_v39  ;;  %v135_v60 = vpop.f32.mrb[7].mxu0  ;;  %1031 = vmatmul.mubr.msk.bf16.vlgmr.msra.gmra.mrb[0].mxu1 %vm214_vm2, %v200_v52  ;;  %v185_v62 = vmax.f32 %v141_v55, 0.0 }
  0xe7   :  { %v136_v61 = vadd.f32 %v914_v39, %v135_v60  ;;  %v183_v0 = vmax.f32 %v133_v57, 0.0 }
  0xe8   :  { %v186_v63 = vmax.f32 %v144_v59, 0.0 }
  0xe9   :  { %v184_v1 = vmax.f32 %v136_v61, 0.0 }
  0xea   :  { %v202_v2 = vpack.c.bf16 %v186_v63, %v185_v62 }
  0xeb   :  { %v201_v3 = vpack.c.bf16 %v184_v1, %v183_v0  ;;  %v1020_v4 = vpop.f32.mrb[8].mxu0 }
  0xec   :  { %v157_v5 = vadd.f32 %v1020_v4, %v914_v39  ;;  %v148_v6 = vpop.f32.mrb[9].mxu0 }
  0xed   :  { %v149_v7 = vadd.f32 %v914_v39, %v148_v6  ;;  %v1021_v8 = vpop.f32.mrb[10].mxu0  ;;  %1034 = vmatprep.mubr.msk.bf16.mxu1 %vm214_vm2, %v201_v3 }
  0xee   :  { %v160_v9 = vadd.f32 %v1021_v8, %v914_v39  ;;  %v151_v10 = vpop.f32.mrb[11].mxu0  ;;  %1035 = vmatmul.mubr.msk.bf16.gmra.mrb[4].mxu1 %vm214_vm2, %v202_v2  ;;  %v189_v12 = vmax.f32 %v157_v5, 0.0 }
  0xef   :  { %v152_v11 = vadd.f32 %v914_v39, %v151_v10  ;;  %v187_v14 = vmax.f32 %v149_v7, 0.0 }
  0xf0   :  { %v190_v13 = vmax.f32 %v160_v9, 0.0 }
  0xf1   :  { %v188_v15 = vmax.f32 %v152_v11, 0.0 }
  0xf2   :  { %v204_v16 = vpack.c.bf16 %v190_v13, %v189_v12 }
  0xf3   :  { %v203_v17 = vpack.c.bf16 %v188_v15, %v187_v14  ;;  %v1024_v18 = vpop.f32.mrb[12].mxu0 }
  0xf4   :  { %v173_v19 = vadd.f32 %v1024_v18, %v914_v39  ;;  %v164_v20 = vpop.f32.mrb[13].mxu0 }
  0xf5   :  { %v165_v21 = vadd.f32 %v914_v39, %v164_v20  ;;  %v1025_v22 = vpop.f32.mrb[14].mxu0  ;;  %1038 = vmatprep.mubr.msk.bf16.mxu1 %vm214_vm2, %v203_v17 }
  0xf6   :  { %v176_v23 = vadd.f32 %v1025_v22, %v914_v39  ;;  %v167_v24 = vpop.f32.mrb[15].mxu0  ;;  %1039 = vmatmul.mubr.msk.bf16.gmra.mrb[8].mxu1 %vm214_vm2, %v204_v16  ;;  %v193_v26 = vmax.f32 %v173_v19, 0.0 }
  0xf7   :  { %v168_v25 = vadd.f32 %v914_v39, %v167_v24  ;;  %v191_v28 = vmax.f32 %v165_v21, 0.0 }
  0xf8   :  { %v194_v27 = vmax.f32 %v176_v23, 0.0 }
  0xf9   :  { %v192_v29 = vmax.f32 %v168_v25, 0.0  ;;  %v1168_v25 = vmov 0.0  }
  0xfa   :  { %v206_v30 = vpack.c.bf16 %v194_v27, %v193_v26  ;;  %1066 = vmatprep.subr.bf16.mxu1 %v1168_v25  ;;  %1122 = vmatprep.subr.bf16.mxu0 %v1168_v25  ;;  %v932_v26 = vld [vmem:[%s1462_s1 + $0xaa] ss:$0 sm:$0xff] }
  0xfb   :  { %v205_v31 = vpack.c.bf16 %v192_v29, %v191_v28 }
  0xfd   :  { %1042 = vmatprep.mubr.msk.bf16.mxu1 %vm214_vm2, %v205_v31 }
  0xfe   :  { %1043 = vmatmul.mubr.msk.bf16.gmra.mrb[12].mxu1 %vm214_vm2, %v206_v30 }
  0xff   :  { %1082 = vmatprep.mubr.msk.bf16.mxu1 %vm1169_vm3, %v1168_v25 }
 0x1b9   :  { %v1032_v33 = vpop.f32.mrb[0].mxu1 }
 0x1ba   :  { %v282_v34 = vadd.f32 %v1032_v33, %v923_v32  ;;  %v273_v35 = vpop.f32.mrb[1].mxu1 }
 0x1bb   :  { %v274_v36 = vadd.f32 %v923_v32, %v273_v35  ;;  %v1033_v37 = vpop.f32.mrb[2].mxu1 }
 0x1bc   :  { %v285_v38 = vadd.f32 %v1033_v37, %v923_v32  ;;  %v276_v39 = vpop.f32.mrb[3].mxu1  ;;  %v338_v41 = vmax.f32 %v282_v34, 0.0 }
 0x1bd   :  { %v277_v40 = vadd.f32 %v923_v32, %v276_v39  ;;  %v336_v43 = vmax.f32 %v274_v36, 0.0 }
 0x1be   :  { %v339_v42 = vmax.f32 %v285_v38, 0.0 }
 0x1bf   :  { %v337_v44 = vmax.f32 %v277_v40, 0.0 }
 0x1c0   :  { %v357_v45 = vpack.c.bf16 %v339_v42, %v338_v41 }
 0x1c1   :  { %v356_v46 = vpack.c.bf16 %v337_v44, %v336_v43  ;;  %v1036_v47 = vpop.f32.mrb[4].mxu1 }
 0x1c2   :  { %v298_v48 = vadd.f32 %v1036_v47, %v923_v32  ;;  %v289_v49 = vpop.f32.mrb[5].mxu1 }
 0x1c3   :  { %v290_v50 = vadd.f32 %v923_v32, %v289_v49  ;;  %v1037_v51 = vpop.f32.mrb[6].mxu1  ;;  %1050 = vmatprep.mubr.msk.bf16.mxu0 %vm214_vm2, %v356_v46 }
 0x1c4   :  { %v301_v52 = vadd.f32 %v1037_v51, %v923_v32  ;;  %v292_v53 = vpop.f32.mrb[7].mxu1  ;;  %1051 = vmatmul.mubr.msk.bf16.vlgmr.msra.gmra.mrb[16].mxu0 %vm214_vm2, %v357_v45  ;;  %v342_v55 = vmax.f32 %v298_v48, 0.0 }
 0x1c5   :  { %v293_v54 = vadd.f32 %v923_v32, %v292_v53  ;;  %v340_v57 = vmax.f32 %v290_v50, 0.0 }
 0x1c6   :  { %v343_v56 = vmax.f32 %v301_v52, 0.0 }
 0x1c7   :  { %v341_v58 = vmax.f32 %v293_v54, 0.0 }
 0x1c8   :  { %v359_v59 = vpack.c.bf16 %v343_v56, %v342_v55 }
 0x1c9   :  { %v358_v60 = vpack.c.bf16 %v341_v58, %v340_v57  ;;  %v1040_v61 = vpop.f32.mrb[8].mxu1 }
 0x1ca   :  { %v314_v62 = vadd.f32 %v1040_v61, %v923_v32  ;;  %v305_v63 = vpop.f32.mrb[9].mxu1 }
 0x1cb   :  { %v306_v0 = vadd.f32 %v923_v32, %v305_v63  ;;  %v1041_v1 = vpop.f32.mrb[10].mxu1  ;;  %1054 = vmatprep.mubr.msk.bf16.mxu0 %vm214_vm2, %v358_v60 }
 0x1cc   :  { %v317_v2 = vadd.f32 %v1041_v1, %v923_v32  ;;  %v308_v3 = vpop.f32.mrb[11].mxu1  ;;  %1055 = vmatmul.mubr.msk.bf16.gmra.mrb[20].mxu0 %vm214_vm2, %v359_v59  ;;  %v346_v5 = vmax.f32 %v314_v62, 0.0 }
 0x1cd   :  { %v309_v4 = vadd.f32 %v923_v32, %v308_v3  ;;  %v344_v7 = vmax.f32 %v306_v0, 0.0 }
 0x1ce   :  { %v347_v6 = vmax.f32 %v317_v2, 0.0 }
 0x1cf   :  { %v345_v8 = vmax.f32 %v309_v4, 0.0 }
 0x1d0   :  { %v361_v9 = vpack.c.bf16 %v347_v6, %v346_v5 }
 0x1d1   :  { %v360_v10 = vpack.c.bf16 %v345_v8, %v344_v7  ;;  %v1044_v11 = vpop.f32.mrb[12].mxu1 }
 0x1d2   :  { %v330_v12 = vadd.f32 %v1044_v11, %v923_v32  ;;  %v321_v13 = vpop.f32.mrb[13].mxu1 }
 0x1d3   :  { %v322_v14 = vadd.f32 %v923_v32, %v321_v13  ;;  %v1045_v15 = vpop.f32.mrb[14].mxu1  ;;  %1058 = vmatprep.mubr.msk.bf16.mxu0 %vm214_vm2, %v360_v10 }
 0x1d4   :  { %v333_v16 = vadd.f32 %v1045_v15, %v923_v32  ;;  %v324_v17 = vpop.f32.mrb[15].mxu1  ;;  %1059 = vmatmul.mubr.msk.bf16.gmra.mrb[24].mxu0 %vm214_vm2, %v361_v9  ;;  %v350_v19 = vmax.f32 %v330_v12, 0.0 }
 0x1d5   :  { %v325_v18 = vadd.f32 %v923_v32, %v324_v17  ;;  %v348_v21 = vmax.f32 %v322_v14, 0.0 }
 0x1d6   :  { %v351_v20 = vmax.f32 %v333_v16, 0.0 }
 0x1d7   :  { %v349_v22 = vmax.f32 %v325_v18, 0.0 }
 0x1d8   :  { %v363_v23 = vpack.c.bf16 %v351_v20, %v350_v19  ;;  %v508_v19 = vld [vmem:[%s1464_s3] sm:$0xff]  ;;  %v558_v20 = vld [vmem:[%s1462_s1 + $0x48] sm:$0xff] }
 0x1d9   :  { %v362_v24 = vpack.c.bf16 %v349_v22, %v348_v21  ;;  %v559_v21 = vld [vmem:[%s1462_s1 + $0x50] sm:$0xff]  ;;  %v509_v22 = vpack.c.bf16 %v508_v19, %v508_v19 }
 0x1db   :  { %1062 = vmatprep.mubr.msk.bf16.mxu0 %vm214_vm2, %v362_v24  ;;  %v560_v24 = vld [vmem:[%s1462_s1 + $0x58] sm:$0xff] }
 0x1dc   :  { %1063 = vmatmul.mubr.msk.bf16.gmra.mrb[28].mxu0 %vm214_vm2, %v363_v23  ;;  %v563_v23 = vpack.c.bf16 %v559_v21, %v558_v20  ;;  %v836_v20 = vld [vmem:[%s1465_s4 + $0x30] sm:$0xff]  ;;  %v837_v21 = vld [vmem:[%s1465_s4 + $0x38] sm:$0xff] }
 0x1dd   :  { %1134 = vmatprep.mubr.msk.bf16.mxu0 %vm1169_vm3, %v1168_v25 }
 0x297   :  { %v1052_v27 = vpop.f32.mrb[16].mxu0 }
 0x298   :  { %v438_v28 = vadd.f32 %v1052_v27, %v932_v26  ;;  %v429_v29 = vpop.f32.mrb[17].mxu0 }
 0x299   :  { %v430_v30 = vadd.f32 %v932_v26, %v429_v29  ;;  %v1053_v31 = vpop.f32.mrb[18].mxu0 }
 0x29a   :  { %v441_v32 = vadd.f32 %v1053_v31, %v932_v26  ;;  %v432_v33 = vpop.f32.mrb[19].mxu0  ;;  %v494_v35 = vmax.f32 %v438_v28, 0.0 }
 0x29b   :  { %v433_v34 = vadd.f32 %v932_v26, %v432_v33  ;;  %v492_v37 = vmax.f32 %v430_v30, 0.0  ;;  %v941_v33 = vld [vmem:[%s1462_s1 + $0xab] ss:$0 sm:$0xff] }
 0x29c   :  { %v495_v36 = vmax.f32 %v441_v32, 0.0 }
 0x29d   :  { %v493_v38 = vmax.f32 %v433_v34, 0.0 }
 0x29e   :  { %v511_v39 = vpack.c.bf16 %v495_v36, %v494_v35 }
 0x29f   :  { %v510_v40 = vpack.c.bf16 %v493_v38, %v492_v37  ;;  %v1056_v41 = vpop.f32.mrb[20].mxu0 }
 0x2a0   :  { %v454_v42 = vadd.f32 %v1056_v41, %v932_v26  ;;  %v445_v43 = vpop.f32.mrb[21].mxu0 }
 0x2a1   :  { %v446_v44 = vadd.f32 %v932_v26, %v445_v43  ;;  %v1057_v45 = vpop.f32.mrb[22].mxu0  ;;  %1067 = vmatpush3.bf16.msra.mxu1 %v510_v40  ;;  %v614_v40 = vld [vmem:[%s1463_s2] sm:$0xff]  ;;  %v664_v43 = vld [vmem:[%s1462_s1 + $0x70] sm:$0xff] }
 0x2a2   :  { %v457_v46 = vadd.f32 %v1057_v45, %v932_v26  ;;  %v448_v47 = vpop.f32.mrb[23].mxu0  ;;  %1068 = vmatprep.subr.bf16.mxu1 %v1168_v25  ;;  %v498_v49 = vmax.f32 %v454_v42, 0.0  ;;  %v663_v42 = vld [vmem:[%s1462_s1 + $0x68] sm:$0xff]  ;;  %v615_v45 = vpack.c.bf16 %v614_v40, %v614_v40 }
 0x2a3   :  { %v449_v48 = vadd.f32 %v932_v26, %v448_v47  ;;  %v496_v51 = vmax.f32 %v446_v44, 0.0  ;;  %v665_v47 = vld [vmem:[%s1462_s1 + $0x78] sm:$0xff] }
 0x2a4   :  { %v499_v50 = vmax.f32 %v457_v46, 0.0  ;;  %v668_v46 = vpack.c.bf16 %v664_v43, %v663_v42 }
 0x2a5   :  { %v497_v52 = vmax.f32 %v449_v48, 0.0  ;;  %1069 = vmatpush3.bf16.msra.mxu1 %v511_v39  ;;  %v666_v48 = vld [vmem:[%s1462_s1 + $0x80] sm:$0xff] }
 0x2a6   :  { %v513_v53 = vpack.c.bf16 %v499_v50, %v498_v49  ;;  %1070 = vmatprep.subr.bf16.mxu1 %v1168_v25  ;;  %v669_v49 = vpack.c.bf16 %v666_v48, %v665_v47 }
 0x2a7   :  { %v512_v54 = vpack.c.bf16 %v497_v52, %v496_v51  ;;  %v1060_v55 = vpop.f32.mrb[24].mxu0 }
 0x2a8   :  { %v470_v56 = vadd.f32 %v1060_v55, %v932_v26  ;;  %v461_v57 = vpop.f32.mrb[25].mxu0  ;;  %v944_v55 = vld [vmem:[%s1462_s1 + $0xac] ss:$0 sm:$0xff] }
 0x2a9   :  { %v462_v58 = vadd.f32 %v932_v26, %v461_v57  ;;  %v1061_v59 = vpop.f32.mrb[26].mxu0  ;;  %1071 = vmatpush3.bf16.msra.mxu1 %v512_v54 }
 0x2aa   :  { %v473_v60 = vadd.f32 %v1061_v59, %v932_v26  ;;  %v464_v61 = vpop.f32.mrb[27].mxu0  ;;  %1072 = vmatprep.subr.bf16.mxu1 %v1168_v25  ;;  %v502_v63 = vmax.f32 %v470_v56, 0.0 }
 0x2ab   :  { %v465_v62 = vadd.f32 %v932_v26, %v464_v61  ;;  %v500_v1 = vmax.f32 %v462_v58, 0.0 }
 0x2ac   :  { %v503_v0 = vmax.f32 %v473_v60, 0.0 }
 0x2ad   :  { %v501_v2 = vmax.f32 %v465_v62, 0.0  ;;  %1073 = vmatpush3.bf16.msra.mxu1 %v513_v53 }
 0x2ae   :  { %v515_v3 = vpack.c.bf16 %v503_v0, %v502_v63  ;;  %1074 = vmatprep.subr.bf16.mxu1 %v1168_v25  ;;  %v763_v63 = vld [vmem:[%s1462_s1 + $0x88] sm:$0xff]  ;;  %v764_v0 = vld [vmem:[%s1462_s1 + $0x90] sm:$0xff] }
 0x2af   :  { %v514_v4 = vpack.c.bf16 %v501_v2, %v500_v1  ;;  %v1064_v5 = vpop.f32.mrb[28].mxu0  ;;  %v768_v2 = vpack.c.bf16 %v764_v0, %v763_v63 }
 0x2b0   :  { %v486_v6 = vadd.f32 %v1064_v5, %v932_v26  ;;  %v477_v7 = vpop.f32.mrb[29].mxu0 }
 0x2b1   :  { %v478_v8 = vadd.f32 %v932_v26, %v477_v7  ;;  %v1065_v9 = vpop.f32.mrb[30].mxu0  ;;  %1075 = vmatpush3.bf16.msra.mxu1 %v514_v4  ;;  %v766_v4 = vld [vmem:[%s1462_s1 + $0xa0] sm:$0xff] }
 0x2b2   :  { %v489_v10 = vadd.f32 %v1065_v9, %v932_v26  ;;  %v480_v11 = vpop.f32.mrb[31].mxu0  ;;  %1076 = vmatprep.subr.bf16.mxu1 %v1168_v25  ;;  %v506_v13 = vmax.f32 %v486_v6, 0.0 }
 0x2b3   :  { %v481_v12 = vadd.f32 %v932_v26, %v480_v11  ;;  %v504_v15 = vmax.f32 %v478_v8, 0.0  ;;  %v561_v26 = vld [vmem:[%s1462_s1 + $0x60] sm:$0xff] }
 0x2b4   :  { %v507_v14 = vmax.f32 %v489_v10, 0.0  ;;  %v564_v27 = vpack.c.bf16 %v561_v26, %v560_v24  ;;  %v830_v11 = vld [vmem:[%s1465_s4] sm:$0xff]  ;;  %v839_v24 = vld [vmem:[%s1465_s4 + $0x48] sm:$0xff] }
 0x2b5   :  { %v505_v16 = vmax.f32 %v481_v12, 0.0  ;;  %1077 = vmatpush3.bf16.msra.mxu1 %v515_v3  ;;  %v765_v3 = vld [vmem:[%s1462_s1 + $0x98] sm:$0xff]  ;;  %v831_v12 = vld [vmem:[%s1465_s4 + $0x8] sm:$0xff] }
 0x2b6   :  { %v517_v17 = vpack.c.bf16 %v507_v14, %v506_v13  ;;  %1078 = vmatprep.subr.bf16.mxu1 %v1168_v25  ;;  %v769_v5 = vpack.c.bf16 %v766_v4, %v765_v3  ;;  %v832_v13 = vld [vmem:[%s1465_s4 + $0x10] sm:$0xff]  ;;  %v843_v14 = vpack.c.bf16 %v831_v12, %v830_v11 }
 0x2b7   :  { %v516_v18 = vpack.c.bf16 %v505_v16, %v504_v15  ;;  %v833_v15 = vld [vmem:[%s1465_s4 + $0x18] sm:$0xff] }
 0x2b8   :  { %1123 = vmatpush3.bf16.msra.mxu0 %v843_v14  ;;  %v844_v16 = vpack.c.bf16 %v833_v15, %v832_v13 }
 0x2b9   :  { %1079 = vmatpush3.bf16.msra.mxu1 %v516_v18  ;;  %1124 = vmatprep.subr.bf16.mxu0 %v1168_v25  ;;  %v835_v18 = vld [vmem:[%s1465_s4 + $0x28] sm:$0xff] }
 0x2ba   :  { %1080 = vmatprep.subr.bf16.mxu1 %v1168_v25 }
 0x2bc   :  { %1125 = vmatpush3.bf16.msra.mxu0 %v844_v16 }
 0x2bd   :  { %1081 = vmatpush3.bf16.msra.mxu1 %v517_v17  ;;  %v834_v17 = vld [vmem:[%s1465_s4 + $0x20] sm:$0xff]  ;;  %1126 = vmatprep.subr.bf16.mxu0 %v1168_v25 }
 0x2be   :  { %1086 = vmatprep.subr.bf16.mxu1 %v1168_v25  ;;  %v845_v19 = vpack.c.bf16 %v835_v18, %v834_v17 }
 0x2c0   :  { %1083 = vmatmul.mubr.bf16.vlgmr.msra.gmra.mrb[16].mxu1 %v509_v22  ;;  %1127 = vmatpush3.bf16.msra.mxu0 %v845_v19  ;;  %v846_v22 = vpack.c.bf16 %v837_v21, %v836_v20 }
 0x2c1   :  { %1087 = vmatpush3.bf16.msra.mxu1 %v563_v23  ;;  %1090 = vmatprep.mubr.msk.bf16.mxu1 %vm1169_vm3, %v1168_v25  ;;  %v838_v23 = vld [vmem:[%s1465_s4 + $0x40] sm:$0xff] }
 0x2c2   :  { %1088 = vmatprep.subr.bf16.mxu1 %v1168_v25  ;;  %1128 = vmatprep.subr.bf16.mxu0 %v1168_v25  ;;  %v847_v26 = vpack.c.bf16 %v839_v24, %v838_v23 }
 0x2c4   :  { %1129 = vmatpush3.bf16.msra.mxu0 %v846_v22 }
 0x2c5   :  { %1089 = vmatpush3.bf16.msra.mxu1 %v564_v27  ;;  %1130 = vmatprep.subr.bf16.mxu0 %v1168_v25  ;;  %v840_v27 = vld [vmem:[%s1465_s4 + $0x50] sm:$0xff] }
 0x2c6   :  { %1094 = vmatprep.subr.bf16.mxu1 %v1168_v25 }
 0x2c8   :  { %1131 = vmatpush3.bf16.msra.mxu0 %v847_v26 }
 0x2c9   :  { %1132 = vmatprep.subr.bf16.mxu0 %v1168_v25 }
 0x393   :  { %v552_v28 = vpop.f32.mrb[16].mxu1 }
 0x394   :  { %v562_v29 = vpack.c.bf16 %v552_v28, %v552_v28  ;;  %v1084_v30 = vpop.f32.mrb[17].mxu1  ;;  %v841_v28 = vld [vmem:[%s1465_s4 + $0x58] sm:$0xff] }
 0x395   :  { %v555_v31 = vpop.f32.mrb[18].mxu1  ;;  %v947_v30 = vld [vmem:[%s1462_s1 + $0xad] ss:$0 sm:$0xff]  ;;  %s1172_s1 = smov [#allocation2]  }
 0x396   :  { %v1085_v32 = vpop.f32.mrb[19].mxu1  ;;  %1091 = vmatmul.mubr.msk.bf16.vlgmr.msra.gmra.mrb[20].mxu1 %vm214_vm2, %v562_v29  ;;  %v848_v29 = vpack.c.bf16 %v841_v28, %v840_v27  ;;  %s906_s4 = sshll.u32 %s1172_s1, 4  ;;  %s907_s4 = int_to_ptr.vmem [resolvable:$true] %s906_s4 }
 0x397   :  { %1096 = vmatprep.mubr.msk.bf16.mxu1 %vm1169_vm3, %v1168_v25  ;;  %s1144_s27 = scalar_lea.vmem %s907_s4, 16  ;;  %s1148_s28 = scalar_lea.vmem %s907_s4, 32 }
 0x398   :  { %1133 = vmatpush3.bf16.msra.mxu0 %v848_v29  ;;  %p1145_p0 = scmp.ne.s32.totalorder %s907_s4, %s1144_s27  ;;  %p1149_p1 = scmp.lt.s32.totalorder %s907_s4, %s907_s4 }
 0x399   :  { %p1150_p2 = scmp.lt.s32.totalorder %s1148_s28, %s1144_s27 }
 0x39b   :  { %p1151_p3 = por %p1150_p2, %p1149_p1 }
 0x39d   :  { %p1152_p4 = pnand %p1151_p3, %p1145_p0 }
 0x469   :  { %v607_v34 = vpop.f32.mrb[20].mxu1 }
 0x46a   :  { %v608_v35 = vadd.f32 %v941_v33, %v607_v34  ;;  %v1092_v36 = vpop.f32.mrb[21].mxu1 }
 0x46b   :  { %v610_v37 = vpop.f32.mrb[22].mxu1 }
 0x46c   :  { %v1352_v38 = vmax.f32 %v608_v35, 0.0  ;;  %v1093_v39 = vpop.f32.mrb[23].mxu1 }
 0x46e   :  { %v616_v41 = vpack.c.bf16 %v1352_v38, %v1352_v38 }
 0x470   :  { %v621_v44 = vsel %vm78_vm0, %v616_v41, 0 }
 0x471   :  { %1095 = vmatpush3.bf16.msra.mxu1 %v621_v44 }
 0x472   :  { %1100 = vmatprep.subr.bf16.mxu1 %v1168_v25 }
 0x474   :  { %1097 = vmatmul.mubr.msk.bf16.vlgmr.msra.gmra.mrb[24].mxu1 %vm53_vm1, %v615_v45 }
 0x475   :  { %1101 = vmatpush3.bf16.msra.mxu1 %v668_v46  ;;  %1104 = vmatprep.mubr.msk.bf16.mxu1 %vm1169_vm3, %v1168_v25 }
 0x476   :  { %1102 = vmatprep.subr.bf16.mxu1 %v1168_v25 }
 0x479   :  { %1103 = vmatpush3.bf16.msra.mxu1 %v669_v49 }
 0x47a   :  { %1108 = vmatprep.subr.bf16.mxu1 %v1168_v25 }
 0x547   :  { %v657_v50 = vpop.f32.mrb[24].mxu1 }
 0x548   :  { %v667_v51 = vpack.c.bf16 %v657_v50, %v657_v50  ;;  %v1098_v52 = vpop.f32.mrb[25].mxu1 }
 0x549   :  { %v660_v53 = vpop.f32.mrb[26].mxu1 }
 0x54a   :  { %v1099_v54 = vpop.f32.mrb[27].mxu1  ;;  %1105 = vmatmul.mubr.msk.bf16.vlgmr.msra.gmra.mrb[28].mxu1 %vm214_vm2, %v667_v51 }
 0x54b   :  { %1110 = vmatprep.mubr.msk.bf16.mxu1 %vm1169_vm3, %v1168_v25 }
 0x61d   :  { %v712_v56 = vpop.f32.mrb[28].mxu1 }
 0x61e   :  { %v713_v57 = vadd.f32 %v944_v55, %v712_v56  ;;  %v1106_v58 = vpop.f32.mrb[29].mxu1 }
 0x61f   :  { %v715_v59 = vpop.f32.mrb[30].mxu1 }
 0x620   :  { %v718_v60 = vmax.f32 %v713_v57, 0.0  ;;  %v1107_v61 = vpop.f32.mrb[31].mxu1 }
 0x622   :  { %v719_v62 = vpack.c.bf16 %v718_v60, %v718_v60  ;;  %820 = vrot.lane.b32.xlu0 %v718_v60, %s1170_s19 }
 0x624   :  { %v721_v1 = vsel %vm78_vm0, %v719_v62, 0 }
 0x625   :  { %1109 = vmatpush3.bf16.msra.mxu1 %v721_v1 }
 0x626   :  { %1114 = vmatprep.subr.bf16.mxu1 %v1168_v25 }
 0x628   :  { %1111 = vmatmul.mubr.msk.bf16.vlgmr.msra.gmra.mrb[32].mxu1 %vm53_vm1, %v615_v45 }
 0x629   :  { %1115 = vmatpush3.bf16.msra.mxu1 %v768_v2  ;;  %1118 = vmatprep.mubr.msk.bf16.mxu1 %vm1169_vm3, %v1168_v25 }
 0x62a   :  { %1116 = vmatprep.subr.bf16.mxu1 %v1168_v25 }
 0x62d   :  { %1117 = vmatpush3.bf16.msra.mxu1 %v769_v5 }
 0x694   :  { %v821_v36 = vpop.permute.xlu0 %820 }
 0x695   :  { %v827_v37 = vsel %vm214_vm2, %v1352_v38, %v821_v36 }
 0x6fb   :  { %v757_v6 = vpop.f32.mrb[32].mxu1 }
 0x6fc   :  { %v767_v7 = vpack.c.bf16 %v757_v6, %v757_v6  ;;  %v1112_v8 = vpop.f32.mrb[33].mxu1 }
 0x6fd   :  { %v760_v9 = vpop.f32.mrb[34].mxu1 }
 0x6fe   :  { %1119 = vmatmul.mubr.msk.bf16.vlgmr.msra.gmra.mrb[36].mxu1 %vm214_vm2, %v767_v7  ;;  %v1113_v10 = vpop.f32.mrb[35].mxu1 }
 0x7d1   :  { %v812_v31 = vpop.f32.mrb[36].mxu1 }
 0x7d2   :  { %v813_v32 = vadd.f32 %v947_v30, %v812_v31  ;;  %v1120_v33 = vpop.f32.mrb[37].mxu1 }
 0x7d3   :  { %v815_v34 = vpop.f32.mrb[38].mxu1 }
 0x7d4   :  { %v818_v35 = vmax.f32 %v813_v32, 0.0  ;;  %v1121_v25 = vpop.f32.mrb[39].mxu1 }
 0x7d6   :  { %824 = vrot.lane.b32.xlu0 %v818_v35, %s1171_s26 }
 0x848   :  { %v825_v39 = vpop.permute.xlu0 %824 }
 0x849   :  { %v829_v40 = vsel %vm828_vm4, %v827_v37, %v825_v39 }
 0x84a   :  { %v842_v41 = vpack.c.bf16 %v829_v40, %v829_v40 }
 0x84c   :  { %1135 = vmatmul.mubr.msk.bf16.vlgmr.msra.gmra.mrb[32].mxu0 %vm849_vm5, %v842_v41 }
 0x91f   :  { %v887_v42 = vpop.f32.mrb[32].mxu0 }
 0x920   :  { %v893_v43 = vrot.slane %v887_v42, 4  ;;  %v1136_v44 = vpop.f32.mrb[33].mxu0 }
 0x921   :  { %v890_v45 = vpop.f32.mrb[34].mxu0 }
 0x922   :  { %v894_v46 = vadd.f32 %v893_v43, %v887_v42  ;;  %v1137_v47 = vpop.f32.mrb[35].mxu0 }
 0x924   :  { %v895_v48 = vrot.slane %v894_v46, 2 }
 0x926   :  { %v896_v49 = vadd.f32 %v895_v48, %v894_v46 }
 0x928   :  { %v897_v50 = vrot.slane %v896_v49, 1 }
 0x92a   :  { %v898_v51 = vadd.f32 %v897_v50, %v896_v49 }
 0x92c   :  { %899 = vst [vmem:[#allocation2] sm:$0x1] %v898_v51 }
 0x92d   :  { %1155 = shalt.err (!%p1152_p4)
}
 0x92e   :  { %s1156_s30 = scalar_lea.hbm %s1466_s5, 16 }
 0x92f   :  { %p1157_p5 = scmp.ne.s32.totalorder %s1466_s5, %s1156_s30  ;;  %p1160_p6 = scmp.lt.u32.totalorder %s1156_s30, %s1466_s5 }
 0x931   :  { %p1162_p7 = pnand %p1160_p6, %p1157_p5 }
 0x933   :  { %1165 = shalt.err (!%p1162_p7)
}
 0x934   :  { %909 = dma.vmem_to_hbm [thread:$0]  %s907_s4, 16, %s1466_s5, [#allocation3]  }
 0x935   :  { %1166 = dma.done.wait [#allocation3], 16  }
 0x936   :  { %1167 = vsyncadd [#allocation3], 4294967280 }
 0x937   :  { %913 = vsyncpa [#allocation3], 1 }

</bundles_post_ra>
